<compile_context>
chip_gen: v5e
topology: v5e:2x2
jax: 0.10.0
libtpu: 0.0.40
codegen_flags: <defaults>
</compile_context>

<pallas_src>
import jax
import jax.numpy as jnp
from jax.experimental import pallas as pl
from jax.experimental.pallas import tpu as pltpu

_LANE = 128
# ~2 MiB per tile buffer; total pipelined VMEM = 2 arrays x 2 buffers x tile.
_TARGET_TILE_BYTES = 2 * 1024 * 1024


def _mul_const_kernel(c_ref, x_ref, o_ref):
    # c_ref: (1,) scalar in SMEM (scalar prefetch).  x_ref/o_ref: VMEM tiles.
    c = c_ref[0]
    o_ref[...] = (x_ref[...].astype(c.dtype) * c).astype(o_ref.dtype)


def _sublane_multiple(dtype) -> int:
    # (8,128) for 32-bit, (16,128) for 16-bit, (32,128) for 8-bit dtypes.
    itemsize = jnp.dtype(dtype).itemsize
    return max(8, 32 // max(1, itemsize))


def _pick_slab_width(n_elems: int):
    """Largest multiple of 128 (capped at 4096) that divides n_elems, else None."""
    if n_elems % _LANE != 0:
        return None
    m = n_elems // _LANE
    for d in range(min(m, 32), 0, -1):  # C = 128*d <= 4096 lanes
        if m % d == 0:
            return _LANE * d
    return _LANE


def multiply_constant(x: jax.Array, constant) -> jax.Array:
    """Pallas TPU implementation of `constant * x` (elementwise)."""
    orig_shape = x.shape
    out_dtype = jnp.result_type(x.dtype, constant)

    n = x.size
    if n == 0:
        return (jnp.asarray(constant, out_dtype) * x).astype(out_dtype)

    # Scalar carrier dtype for the SMEM-resident constant.
    compute_dtype = jnp.int32 if jnp.issubdtype(out_dtype, jnp.integer) else jnp.float32
    c_arr = jnp.asarray(constant, compute_dtype).reshape(1)

    itemsize = jnp.dtype(x.dtype).itemsize
    sub = _sublane_multiple(x.dtype)
    flat = x.reshape(-1)

    slab_c = _pick_slab_width(n)
    if slab_c is not None:
        # Lane-dense slab: (rows, C) with C a large multiple of 128 dividing n.
        C = slab_c
        R = n // C
        x2 = flat.reshape(R, C)
        tr_target = max(sub, (_TARGET_TILE_BYTES // (C * itemsize)) // sub * sub)
        tr = R if R <= tr_target else tr_target  # full dim (legal) or masked edge
        tc = C
    else:
        # Rare fallback: element count not a multiple of 128.  Single long row,
        # tiled along lanes, partial edge block masked by Pallas.
        # TODO(synk): (1, tc) tiles use only one sublane per vreg; acceptable for
        # this rare path, the main path above is lane+sublane dense.
        R, C = 1, n
        x2 = flat.reshape(1, n)
        tc_target = max(_LANE, (_TARGET_TILE_BYTES // (sub * itemsize)) // _LANE * _LANE)
        tr = 1
        tc = C if C <= tc_target else tc_target

    grid = (pl.cdiv(R, tr), pl.cdiv(C, tc))

    out2 = pl.pallas_call(
        _mul_const_kernel,
        out_shape=jax.ShapeDtypeStruct((R, C), out_dtype),
        grid_spec=pltpu.PrefetchScalarGridSpec(
            num_scalar_prefetch=1,
            grid=grid,
            in_specs=[pl.BlockSpec((tr, tc), lambda i, j, c: (i, j))],
            out_specs=pl.BlockSpec((tr, tc), lambda i, j, c: (i, j)),
        ),
        compiler_params=pltpu.CompilerParams(
            dimension_semantics=("parallel", "parallel"),
            vmem_limit_bytes=32 * 1024 * 1024,
        ),
    )(c_arr, x2)

    return out2.reshape(orig_shape)


if __name__ == "__main__":
    key = jax.random.PRNGKey(0)
    constant = 2.5  # deterministic "parameter" from __init__

    # Small NCHW-shaped input consistent with the module's typical usage.
    x = jax.random.normal(key, (2, 4, 16, 16), dtype=jnp.float32)
    y = jax.block_until_ready(multiply_constant(x, constant))
    y_ref = constant * x
    assert y.shape == x.shape and y.dtype == y_ref.dtype
    assert jnp.allclose(y, y_ref, atol=1e-6, rtol=1e-6)

    # Odd-sized input (element count not a multiple of 128) exercises the fallback path.
    x_odd = jax.random.normal(jax.random.PRNGKey(1), (3, 5, 7), dtype=jnp.float32)
    y_odd = jax.block_until_ready(multiply_constant(x_odd, constant))
    assert jnp.allclose(y_odd, constant * x_odd, atol=1e-6, rtol=1e-6)

    print("KERNEL_OK")
</pallas_src>

<mosaic_0001>
module attributes {stable_mosaic.version = 11 : i64} {
  func.func @_mul_const_kernel(%arg0: i32, %arg1: i32, %arg2: memref<1xf32, #tpu.memory_space<smem>>, %arg3: memref<1x2048xf32, #tpu.memory_space<vmem>>, %arg4: memref<1x2048xf32, #tpu.memory_space<vmem>>) attributes {dimension_semantics = [#tpu.dimension_semantics<parallel>, #tpu.dimension_semantics<parallel>], iteration_bounds = array<i64: 1, 1>, scalar_prefetch = 1 : i64, scratch_operands = 0 : i64, tpu.core_type = #tpu.core_type<tc>, window_params = [{transform_indices = @transform_0, window_bounds = array<i64: 1, 2048>}, {transform_indices = @transform_1, window_bounds = array<i64: 1, 2048>}]} {
    %c0 = arith.constant 0 : index
    %0 = memref.load %arg2[%c0] : memref<1xf32, #tpu.memory_space<smem>>
    %c0_0 = arith.constant 0 : index
    %c0_1 = arith.constant 0 : index
    %1 = vector.load %arg3[%c0_0, %c0_1] : memref<1x2048xf32, #tpu.memory_space<vmem>>, vector<1x2048xf32>
    %2 = vector.broadcast %0 : f32 to vector<1x2048xf32>
    %3 = arith.mulf %1, %2 : vector<1x2048xf32>
    %c0_2 = arith.constant 0 : index
    %c0_3 = arith.constant 0 : index
    %4 = vector.load %arg4[%c0_2, %c0_3] : memref<1x2048xf32, #tpu.memory_space<vmem>>, vector<1x2048xf32>
    tpu.vector_store %arg4[%c0_2, %c0_3], %3 {strides = array<i32>} : memref<1x2048xf32, #tpu.memory_space<vmem>>, vector<1x2048xf32>,
    return
  }
  func.func @transform_0(%arg0: i32, %arg1: i32, %arg2: memref<1xf32, #tpu.memory_space<smem>>) -> (i32, i32) {
    %c0_i32 = arith.constant 0 : i32
    return %arg0, %arg1 : i32, i32
  }
  func.func @transform_1(%arg0: i32, %arg1: i32, %arg2: memref<1xf32, #tpu.memory_space<smem>>) -> (i32, i32) {
    %c0_i32 = arith.constant 0 : i32
    return %arg0, %arg1 : i32, i32
  }
}

</mosaic_0001>

<bundles_post_ra>
// kernel: tpu_custom_call.1
= control target key start
LH: loop header
LB: loop body
LE: loop exit
PB: predicated region body
PF: predicated region fallthrough
CT: control target
= control target key end

     0   :  { %8 = vsyncpa [#allocation5], 0  ;;  %s130_s0 = inlined_call_operand.<no memory space> [shape: f32[1], index: 0, kind: input, shape index: {}]   ;;  %s131_s1 = inlined_call_operand.hbm [shape: f32[1,2048], index: 1, kind: input, shape index: {}]   ;;  %s132_s2 = inlined_call_operand.hbm [shape: f32[1,2048], index: 2, kind: output, shape index: {}]  }
   0x1   :  { %9 = vsyncpa [#allocation6], 0  ;;  %s15_s11 = sshll.u32 %s131_s1, 4  ;;  %s104_s12 = smov [#allocation4]   ;;  %s16_s11 = int_to_ptr.hbm [resolvable:$true] %s15_s11 }
   0x2   :  { %s17_s13 = sshll.u32 %s104_s12, 4  ;;  %s18_s13 = int_to_ptr.vmem [resolvable:$true] %s17_s13 }
   0x3   :  { %20 = dma.hbm_to_vmem [thread:$0]  %s16_s11, 256, %s18_s13, [#allocation5]  }
   0x4   :  { %100 = dma.done.wait [#allocation5], 256  }
   0x5   :  { %101 = vsyncadd [#allocation5], 4294967040  ;;  %v28_v0 = vstv %s130_s0  ;;  %s105_s16 = smov [#allocation7]   ;;  %s40_s20 = sshll.u32 %s132_s2, 4  ;;  %v26_v1 = vld [vmem:[#allocation4] sm:$0xff]  ;;  %v27_v2 = vld [vmem:[#allocation4 + $0x8] sm:$0xff]  ;;  %s41_s20 = int_to_ptr.hbm [resolvable:$true] %s40_s20 }
   0x6   :  { %s38_s17 = sshll.u32 %s105_s16, 4  ;;  %v29_v3 = vmul.f32 %v28_v0, %v26_v1  ;;  %v30_v4 = vmul.f32 %v28_v0, %v27_v2  ;;  %s39_s17 = int_to_ptr.vmem [resolvable:$true] %s38_s17 }
   0x8   :  { %31 = vst [vmem:[#allocation7] sm:$0xff] %v29_v3 }
   0x9   :  { %32 = vst [vmem:[#allocation7 + $0x8] sm:$0xff] %v30_v4 }
   0xa   :  { %43 = dma.vmem_to_hbm [thread:$0]  %s39_s17, 256, %s41_s20, [#allocation6]  }
   0xb   :  { %102 = dma.done.wait [#allocation6], 256  }
   0xc   :  { %103 = vsyncadd [#allocation6], 4294967040 }
   0xd   :  { %48 = vsyncpa [#allocation5], 1 }
   0xe   :  { %49 = vsyncpa [#allocation6], 1 }

</bundles_post_ra>
